<compile_context>
chip_gen: v7x
topology: tpu7x:2x2x1
jax: 0.10.0
libtpu: 0.0.40
codegen_flags: <defaults>
</compile_context>

<pallas_src>
import jax
import jax.numpy as jnp
from jax.experimental import pallas as pl
from jax.experimental.pallas import tpu as pltpu


# ----------------------------------------------------------------------------
# Pallas kernel 1: stacked GCN layers (4 x GCNConv + tanh), lane-dense output.
# ----------------------------------------------------------------------------
def gcn_stack_kernel(a_ref, x_ref, ds_ref,
                     w1_ref, w2_ref, w3_ref, w4_ref,
                     b1_ref, b2_ref, b3_ref, b4_ref, h_ref):
    bf16 = jnp.bfloat16
    a_bf = a_ref[...]                 # (N, N) bf16, exact 0/1 entries of A + I
    ds = ds_ref[...]                  # (N, 32) f32, D^-1/2 broadcast over channels

    def layer(h_tilde, w_ref, b_ref):
        # h_tilde: (N, cin) bf16 activations already row-scaled by D^-1/2.
        # D^-1/2 (A+I) D^-1/2 H W == ds * ((A+I) @ (ds * H @ W))
        hw = jnp.dot(h_tilde, w_ref[...], preferred_element_type=jnp.float32)
        agg = jnp.dot(a_bf, hw.astype(bf16), preferred_element_type=jnp.float32)
        return jnp.tanh(agg * ds + b_ref[...])

    h1 = layer(x_ref[...], w1_ref, b1_ref)               # x pre-scaled in wrapper
    h2 = layer((h1 * ds).astype(bf16), w2_ref, b2_ref)
    h3 = layer((h2 * ds).astype(bf16), w3_ref, b3_ref)
    # gcn4 weight/bias zero-padded (out 1 -> 32): output lanes 1..31 are exactly 0.
    h4 = layer((h3 * ds).astype(bf16), w4_ref, b4_ref)

    # Lane-dense (N, 128) output via four aligned 32-wide stores; lane 96 holds
    # the gcn4 output (sort-pool key), lanes 97..127 are exactly zero.
    h_ref[:, 0:32] = h1
    h_ref[:, 32:64] = h2
    h_ref[:, 64:96] = h3
    h_ref[:, 96:128] = h4


# ----------------------------------------------------------------------------
# Pallas kernel 2: conv/MLP head, batched over graphs, position-major rows.
# ----------------------------------------------------------------------------
def head_kernel(pe_ref, po_ref, wc1_ref, wc2_ref, wl1_ref, wl2_ref,
                bc1_ref, bc2_ref, bl1_ref, bl2_ref, o_ref, col_s, z_s):
    bf16 = jnp.bfloat16
    rows = pe_ref.shape[0]            # npos * Bp   (position-major)
    bp = o_ref.shape[0]               # Bp = num_graphs padded to multiple of 8
    npos = rows // bp                 # 15 pooled positions per graph
    nvalid = npos - 4                 # 11 conv2 output positions per graph

    # Conv1d(1,16,97,97) == per-pooled-node (97->16) matmul (weight lane-padded
    # to 128), batched over all graphs.  relu/bias commute with the pairwise
    # max, so MaxPool1d(2,2) fuses as max(even, odd).
    wc1 = wc1_ref[...]
    ye = jnp.dot(pe_ref[...], wc1, preferred_element_type=jnp.float32)
    yo = jnp.dot(po_ref[...], wc1, preferred_element_type=jnp.float32)
    ymax = jnp.maximum(jnp.maximum(ye, yo) + bc1_ref[...], 0.0)   # (npos*Bp, 16)

    # Conv1d(16,32,5,1) via im2col: position-major rows make every shifted
    # window a contiguous, sublane-aligned row block (no cross-graph bleed, no
    # pad rows); ONE (11*Bp,80)@(80,32) matmul replaces 5 K=16 matmuls.
    for j in range(5):
        col_s[:, j * 16:(j + 1) * 16] = ymax[j * bp:(j + nvalid) * bp, :]
    y2 = jnp.maximum(
        jnp.dot(col_s[...].astype(bf16), wc2_ref[...],
                preferred_element_type=jnp.float32) + bc2_ref[...], 0.0)

    # Flatten to (Bp, 352) in (position, channel) order: contiguous aligned row
    # blocks (the old stride-15 sublane gathers are gone), then Linear(352,128)
    # as ONE batched matmul.
    for t in range(nvalid):
        z_s[:, t * 32:(t + 1) * 32] = y2[t * bp:(t + 1) * bp, :]
    z1 = jnp.maximum(
        jnp.dot(z_s[...].astype(bf16), wl1_ref[...],
                preferred_element_type=jnp.float32) + bl1_ref[...], 0.0)

    # Dropout(0.5): eval-mode identity.  Linear(128,1) as VPU multiply + lane
    # reduction (no f32 MXU emulation / width-1 MXU output), then sigmoid.
    # Lane-dense (Bp,128) store; the wrapper extracts column 0.
    z2 = jnp.sum(z1 * wl2_ref[...], axis=-1, keepdims=True) + bl2_ref[...]
    o_ref[...] = jnp.broadcast_to(jax.nn.sigmoid(z2), o_ref.shape)


# ----------------------------------------------------------------------------
# Wrapper / glue
# ----------------------------------------------------------------------------
def build_adj_parts(edge_index, num_nodes):
    """Raw A+I (shipped bf16; entries are exactly 0/1) and D^-1/2 vector."""
    a = jnp.zeros((num_nodes, num_nodes), jnp.float32)
    a = a.at[edge_index[1], edge_index[0]].set(1.0)               # rows = targets
    a_sl = a + jnp.eye(num_nodes, dtype=jnp.float32)
    deg = a_sl.sum(axis=1)
    dinv = jax.lax.rsqrt(deg)
    return a_sl.astype(jnp.bfloat16), dinv


def global_sort_pool(h, num_graphs, k):
    """PyG global_sort_pool for equal-sized graphs: sort each graph's nodes by
    the gcn4 channel (lane 96) descending, keep top-k, zero-pad to k.  Plain-JAX
    glue (argsort/gather has no Pallas primitive)."""
    n_total, d = h.shape
    n_per = n_total // num_graphs
    dense = h.reshape(num_graphs, n_per, d)
    order = jnp.argsort(-dense[:, :, 96], axis=1)                 # sort key = h4
    sorted_h = jnp.take_along_axis(dense, order[:, :, None], axis=1)
    if n_per >= k:
        pooled = sorted_h[:, :k, :]
    else:
        pad = jnp.zeros((num_graphs, k - n_per, d), h.dtype)
        pooled = jnp.concatenate([sorted_h, pad], axis=1)
    return pooled                                                 # (B, k, 128)


def dgcnn_forward(x, edge_index, batch, params, num_graphs, k=30):
    del batch  # equal-sized, contiguously batched graphs assumed (see TODO above)
    n, dim_in = x.shape
    a_bf, dinv = build_adj_parts(edge_index, n)

    # D^-1/2 folded into activations: pre-scale X here; one (N,32) row-scale
    # operand covers every layer (no lane-padded (N,1) block, no N^2 VPU pass).
    x_s = (x * dinv[:, None]).astype(jnp.bfloat16)                # (N, dim_in)
    dscale = jnp.broadcast_to(dinv[:, None], (n, 32))             # (N, 32) f32

    full = lambda s: pl.BlockSpec(s, lambda *_: (0,) * len(s))
    # At large N raise toward ~100 MiB on v5e/v6e; panel-tile instead on v7x.
    cparams = pltpu.CompilerParams(dimension_semantics=("arbitrary",),
                                   vmem_limit_bytes=32 * 1024 * 1024)

    # ---- GCN stack (Pallas): lane-dense (N, 128) output ----
    h = pl.pallas_call(
        gcn_stack_kernel,
        out_shape=jax.ShapeDtypeStruct((n, 128), jnp.float32),
        grid=(1,),
        in_specs=[
            full((n, n)), full((n, dim_in)), full((n, 32)),
            full((dim_in, 32)), full((32, 32)), full((32, 32)), full((32, 32)),
            full((1, 32)), full((1, 32)), full((1, 32)), full((1, 32)),
        ],
        out_specs=full((n, 128)),
        compiler_params=cparams,
    )(a_bf, x_s, dscale,
      params["w1"], params["w2"], params["w3"], params["w4p"],
      params["b1"], params["b2"], params["b3"], params["b4p"])

    # ---- sort pooling (glue) + position-major even/odd split for MaxPool1d(2,2) ----
    pooled = global_sort_pool(h, num_graphs, k)                   # (B, 30, 128)
    npos = k // 2                                                 # 15
    bp = num_graphs + ((-num_graphs) % 8)                         # pad B to mult of 8

    def position_major(arr):                                      # (B, npos, 128)
        arr = jnp.transpose(arr, (1, 0, 2))                       # (npos, B, 128)
        if bp != num_graphs:
            arr = jnp.pad(arr, ((0, 0), (0, bp - num_graphs), (0, 0)))
        return arr.reshape(npos * bp, 128).astype(jnp.bfloat16)   # row = pos*Bp + g

    pe = position_major(pooled[:, 0::2, :])                       # even conv1 positions
    po = position_major(pooled[:, 1::2, :])                       # odd  conv1 positions
    rows = npos * bp
    nvalid = npos - 4                                             # 11

    # ---- conv/MLP head (Pallas), batched over graphs ----
    head_out = pl.pallas_call(
        head_kernel,
        out_shape=jax.ShapeDtypeStruct((bp, 128), jnp.float32),
        grid=(1,),
        in_specs=[
            full((rows, 128)), full((rows, 128)),
            full((128, 16)), full((80, 32)), full((352, 128)), full((1, 128)),
            full((1, 16)), full((1, 32)), full((1, 128)), full((1, 1)),
        ],
        out_specs=full((bp, 128)),
        scratch_shapes=[
            pltpu.VMEM((nvalid * bp, 80), jnp.float32),           # im2col
            pltpu.VMEM((bp, 352), jnp.float32),                   # flatten
        ],
        compiler_params=cparams,
    )(pe, po, params["wc1p"], params["wc2i"], params["wl1"], params["wl2r"],
      params["bc1"], params["bc2"], params["bl1"], params["bl2"])
    return head_out[:num_graphs, 0:1]                             # (num_graphs, 1)


def init_params(key, dim_in):
    ks = jax.random.split(key, 16)
    s = 0.1
    bf16 = jnp.bfloat16
    nrm = lambda i, shape: jax.random.normal(ks[i], shape, jnp.float32) * s

    # GCNConv weights stored (in, out), shipped bf16 (MXU operands); gcn4
    # weight/bias zero-padded to 32 outputs so the stacked output is lane-dense.
    w1 = nrm(0, (dim_in, 32)).astype(bf16)
    w2 = nrm(2, (32, 32)).astype(bf16)
    w3 = nrm(4, (32, 32)).astype(bf16)
    w4p = jnp.zeros((32, 32), jnp.float32).at[:, 0:1].set(nrm(6, (32, 1))).astype(bf16)
    b1, b2, b3 = nrm(1, (1, 32)), nrm(3, (1, 32)), nrm(5, (1, 32))
    b4p = jnp.zeros((1, 32), jnp.float32).at[:, 0:1].set(nrm(7, (1, 1)))

    # Conv1d(1,16,97,97): torch (16,1,97) stored as (97,16), lane-padded to 128.
    wc1p = jnp.zeros((128, 16), jnp.float32).at[0:97, :].set(nrm(8, (97, 16))).astype(bf16)
    bc1 = nrm(9, (1, 16))
    # Conv1d(16,32,5,1): torch (32,16,5) stored tap-major (5,16,32) and reshaped
    # to the im2col layout (80,32) = [tap0 in0..15 | tap1 ... | tap4].
    wc2i = nrm(10, (5, 16, 32)).reshape(80, 32).astype(bf16)
    bc2 = nrm(11, (1, 32))
    # Linear(352,128): torch (128,352) maps via W.reshape(128,32,11)
    # .transpose(2,1,0).reshape(352,128) to the kernel's (position, channel)
    # flatten order.
    wl1 = nrm(12, (352, 128)).astype(bf16)
    bl1 = nrm(13, (1, 128))
    # Linear(128,1): stored row-major (1,128) for the in-kernel VPU reduction.
    wl2r = nrm(14, (1, 128))
    bl2 = nrm(15, (1, 1))

    return {"w1": w1, "w2": w2, "w3": w3, "w4p": w4p,
            "b1": b1, "b2": b2, "b3": b3, "b4p": b4p,
            "wc1p": wc1p, "wc2i": wc2i, "wl1": wl1, "wl2r": wl2r,
            "bc1": bc1, "bc2": bc2, "bl1": bl1, "bl2": bl2}


if __name__ == "__main__":
    key = jax.random.PRNGKey(0)
    k_x, k_p = jax.random.split(key)

    num_graphs = 2
    n_per_graph = 16
    dim_in = 4
    n_nodes = num_graphs * n_per_graph

    # Deterministic node features.
    x = jax.random.normal(k_x, (n_nodes, dim_in), jnp.float32)

    # Deterministic edge_index: a bidirectional ring within each graph.
    edges = []
    for g in range(num_graphs):
        base = g * n_per_graph
        for i in range(n_per_graph):
            a = base + i
            b = base + (i + 1) % n_per_graph
            edges.append((a, b))
            edges.append((b, a))
    edge_index = jnp.asarray(edges, dtype=jnp.int32).T            # (2, 64)
    batch = jnp.repeat(jnp.arange(num_graphs, dtype=jnp.int32), n_per_graph)

    params = init_params(k_p, dim_in)

    out = dgcnn_forward(x, edge_index, batch, params, num_graphs, k=30)
    out = jax.block_until_ready(out)
    assert out.shape == (num_graphs, 1)
    print("KERNEL_OK")
</pallas_src>

<mosaic_0001>
module attributes {stable_mosaic.version = 11 : i64} {
  func.func @gcn_stack_kernel(%arg0: i32, %arg1: memref<32x32xbf16, #tpu.memory_space<vmem>>, %arg2: memref<32x4xbf16, #tpu.memory_space<vmem>>, %arg3: memref<32x32xf32, #tpu.memory_space<vmem>>, %arg4: memref<4x32xbf16, #tpu.memory_space<vmem>>, %arg5: memref<32x32xbf16, #tpu.memory_space<vmem>>, %arg6: memref<32x32xbf16, #tpu.memory_space<vmem>>, %arg7: memref<32x32xbf16, #tpu.memory_space<vmem>>, %arg8: memref<1x32xf32, #tpu.memory_space<vmem>>, %arg9: memref<1x32xf32, #tpu.memory_space<vmem>>, %arg10: memref<1x32xf32, #tpu.memory_space<vmem>>, %arg11: memref<1x32xf32, #tpu.memory_space<vmem>>, %arg12: memref<32x128xf32, #tpu.memory_space<vmem>>) attributes {dimension_semantics = [#tpu.dimension_semantics<arbitrary>], iteration_bounds = array<i64: 1>, scalar_prefetch = 0 : i64, scratch_operands = 0 : i64, tpu.core_type = #tpu.core_type<tc>, window_params = [{pipeline_mode = #tpu.pipeline_mode<synchronous>, transform_indices = @transform_0, window_bounds = array<i64: 32, 32>}, {pipeline_mode = #tpu.pipeline_mode<synchronous>, transform_indices = @transform_1, window_bounds = array<i64: 32, 4>}, {pipeline_mode = #tpu.pipeline_mode<synchronous>, transform_indices = @transform_2, window_bounds = array<i64: 32, 32>}, {pipeline_mode = #tpu.pipeline_mode<synchronous>, transform_indices = @transform_3, window_bounds = array<i64: 4, 32>}, {pipeline_mode = #tpu.pipeline_mode<synchronous>, transform_indices = @transform_4, window_bounds = array<i64: 32, 32>}, {pipeline_mode = #tpu.pipeline_mode<synchronous>, transform_indices = @transform_5, window_bounds = array<i64: 32, 32>}, {pipeline_mode = #tpu.pipeline_mode<synchronous>, transform_indices = @transform_6, window_bounds = array<i64: 32, 32>}, {pipeline_mode = #tpu.pipeline_mode<synchronous>, transform_indices = @transform_7, window_bounds = array<i64: 1, 32>}, {pipeline_mode = #tpu.pipeline_mode<synchronous>, transform_indices = @transform_8, window_bounds = array<i64: 1, 32>}, {pipeline_mode = #tpu.pipeline_mode<synchronous>, transform_indices = @transform_9, window_bounds = array<i64: 1, 32>}, {pipeline_mode = #tpu.pipeline_mode<synchronous>, transform_indices = @transform_10, window_bounds = array<i64: 1, 32>}, {pipeline_mode = #tpu.pipeline_mode<synchronous>, transform_indices = @transform_11, window_bounds = array<i64: 32, 128>}]} {
    %c0 = arith.constant 0 : index
    %c0_0 = arith.constant 0 : index
    %0 = vector.load %arg1[%c0, %c0_0] : memref<32x32xbf16, #tpu.memory_space<vmem>>, vector<32x32xbf16>
    %c0_1 = arith.constant 0 : index
    %c0_2 = arith.constant 0 : index
    %1 = vector.load %arg3[%c0_1, %c0_2] : memref<32x32xf32, #tpu.memory_space<vmem>>, vector<32x32xf32>
    %c0_3 = arith.constant 0 : index
    %c0_4 = arith.constant 0 : index
    %2 = vector.load %arg2[%c0_3, %c0_4] : memref<32x4xbf16, #tpu.memory_space<vmem>>, vector<32x4xbf16>
    %c0_5 = arith.constant 0 : index
    %c0_6 = arith.constant 0 : index
    %3 = vector.load %arg4[%c0_5, %c0_6] : memref<4x32xbf16, #tpu.memory_space<vmem>>, vector<4x32xbf16>
    %cst = arith.constant dense<0.000000e+00> : vector<32x32xf32>
    %4 = tpu.matmul %2, %3, %cst {dimension_numbers = #tpu.dot_dimension_numbers<[1], [0], [0], [1], [0, 0, 1, 1], [], []>} : vector<32x4xbf16>, vector<4x32xbf16>, vector<32x32xf32> -> vector<32x32xf32>
    %5 = arith.truncf %4 : vector<32x32xf32> to vector<32x32xbf16>
    %cst_7 = arith.constant dense<0.000000e+00> : vector<32x32xf32>
    %6 = tpu.matmul %0, %5, %cst_7 {dimension_numbers = #tpu.dot_dimension_numbers<[1], [0], [0], [1], [0, 0, 1, 1], [], []>} : vector<32x32xbf16>, vector<32x32xbf16>, vector<32x32xf32> -> vector<32x32xf32>
    %7 = arith.mulf %6, %1 : vector<32x32xf32>
    %c0_8 = arith.constant 0 : index
    %c0_9 = arith.constant 0 : index
    %8 = vector.load %arg8[%c0_8, %c0_9] : memref<1x32xf32, #tpu.memory_space<vmem>>, vector<1x32xf32>
    %9 = vector.broadcast %8 : vector<1x32xf32> to vector<32x32xf32>
    %10 = arith.addf %7, %9 : vector<32x32xf32>
    %11 = math.tanh %10 : vector<32x32xf32>
    %12 = arith.mulf %11, %1 : vector<32x32xf32>
    %13 = arith.truncf %12 : vector<32x32xf32> to vector<32x32xbf16>
    %c0_10 = arith.constant 0 : index
    %c0_11 = arith.constant 0 : index
    %14 = vector.load %arg5[%c0_10, %c0_11] : memref<32x32xbf16, #tpu.memory_space<vmem>>, vector<32x32xbf16>
    %cst_12 = arith.constant dense<0.000000e+00> : vector<32x32xf32>
    %15 = tpu.matmul %13, %14, %cst_12 {dimension_numbers = #tpu.dot_dimension_numbers<[1], [0], [0], [1], [0, 0, 1, 1], [], []>} : vector<32x32xbf16>, vector<32x32xbf16>, vector<32x32xf32> -> vector<32x32xf32>
    %16 = arith.truncf %15 : vector<32x32xf32> to vector<32x32xbf16>
    %cst_13 = arith.constant dense<0.000000e+00> : vector<32x32xf32>
    %17 = tpu.matmul %0, %16, %cst_13 {dimension_numbers = #tpu.dot_dimension_numbers<[1], [0], [0], [1], [0, 0, 1, 1], [], []>} : vector<32x32xbf16>, vector<32x32xbf16>, vector<32x32xf32> -> vector<32x32xf32>
    %18 = arith.mulf %17, %1 : vector<32x32xf32>
    %c0_14 = arith.constant 0 : index
    %c0_15 = arith.constant 0 : index
    %19 = vector.load %arg9[%c0_14, %c0_15] : memref<1x32xf32, #tpu.memory_space<vmem>>, vector<1x32xf32>
    %20 = vector.broadcast %19 : vector<1x32xf32> to vector<32x32xf32>
    %21 = arith.addf %18, %20 : vector<32x32xf32>
    %22 = math.tanh %21 : vector<32x32xf32>
    %23 = arith.mulf %22, %1 : vector<32x32xf32>
    %24 = arith.truncf %23 : vector<32x32xf32> to vector<32x32xbf16>
    %c0_16 = arith.constant 0 : index
    %c0_17 = arith.constant 0 : index
    %25 = vector.load %arg6[%c0_16, %c0_17] : memref<32x32xbf16, #tpu.memory_space<vmem>>, vector<32x32xbf16>
    %cst_18 = arith.constant dense<0.000000e+00> : vector<32x32xf32>
    %26 = tpu.matmul %24, %25, %cst_18 {dimension_numbers = #tpu.dot_dimension_numbers<[1], [0], [0], [1], [0, 0, 1, 1], [], []>} : vector<32x32xbf16>, vector<32x32xbf16>, vector<32x32xf32> -> vector<32x32xf32>
    %27 = arith.truncf %26 : vector<32x32xf32> to vector<32x32xbf16>
    %cst_19 = arith.constant dense<0.000000e+00> : vector<32x32xf32>
    %28 = tpu.matmul %0, %27, %cst_19 {dimension_numbers = #tpu.dot_dimension_numbers<[1], [0], [0], [1], [0, 0, 1, 1], [], []>} : vector<32x32xbf16>, vector<32x32xbf16>, vector<32x32xf32> -> vector<32x32xf32>
    %29 = arith.mulf %28, %1 : vector<32x32xf32>
    %c0_20 = arith.constant 0 : index
    %c0_21 = arith.constant 0 : index
    %30 = vector.load %arg10[%c0_20, %c0_21] : memref<1x32xf32, #tpu.memory_space<vmem>>, vector<1x32xf32>
    %31 = vector.broadcast %30 : vector<1x32xf32> to vector<32x32xf32>
    %32 = arith.addf %29, %31 : vector<32x32xf32>
    %33 = math.tanh %32 : vector<32x32xf32>
    %34 = arith.mulf %33, %1 : vector<32x32xf32>
    %35 = arith.truncf %34 : vector<32x32xf32> to vector<32x32xbf16>
    %c0_22 = arith.constant 0 : index
    %c0_23 = arith.constant 0 : index
    %36 = vector.load %arg7[%c0_22, %c0_23] : memref<32x32xbf16, #tpu.memory_space<vmem>>, vector<32x32xbf16>
    %cst_24 = arith.constant dense<0.000000e+00> : vector<32x32xf32>
    %37 = tpu.matmul %35, %36, %cst_24 {dimension_numbers = #tpu.dot_dimension_numbers<[1], [0], [0], [1], [0, 0, 1, 1], [], []>} : vector<32x32xbf16>, vector<32x32xbf16>, vector<32x32xf32> -> vector<32x32xf32>
    %38 = arith.truncf %37 : vector<32x32xf32> to vector<32x32xbf16>
    %cst_25 = arith.constant dense<0.000000e+00> : vector<32x32xf32>
    %39 = tpu.matmul %0, %38, %cst_25 {dimension_numbers = #tpu.dot_dimension_numbers<[1], [0], [0], [1], [0, 0, 1, 1], [], []>} : vector<32x32xbf16>, vector<32x32xbf16>, vector<32x32xf32> -> vector<32x32xf32>
    %40 = arith.mulf %39, %1 : vector<32x32xf32>
    %c0_26 = arith.constant 0 : index
    %c0_27 = arith.constant 0 : index
    %41 = vector.load %arg11[%c0_26, %c0_27] : memref<1x32xf32, #tpu.memory_space<vmem>>, vector<1x32xf32>
    %42 = vector.broadcast %41 : vector<1x32xf32> to vector<32x32xf32>
    %43 = arith.addf %40, %42 : vector<32x32xf32>
    %44 = math.tanh %43 : vector<32x32xf32>
    %c0_28 = arith.constant 0 : index
    %c0_29 = arith.constant 0 : index
    %45 = vector.load %arg12[%c0_28, %c0_29] : memref<32x128xf32, #tpu.memory_space<vmem>>, vector<32x32xf32>
    tpu.vector_store %arg12[%c0_28, %c0_29], %11 {strides = array<i32>} : memref<32x128xf32, #tpu.memory_space<vmem>>, vector<32x32xf32>,
    %c0_30 = arith.constant 0 : index
    %c32 = arith.constant 32 : index
    %46 = vector.load %arg12[%c0_30, %c32] : memref<32x128xf32, #tpu.memory_space<vmem>>, vector<32x32xf32>
    tpu.vector_store %arg12[%c0_30, %c32], %22 {strides = array<i32>} : memref<32x128xf32, #tpu.memory_space<vmem>>, vector<32x32xf32>,
    %c0_31 = arith.constant 0 : index
    %c64 = arith.constant 64 : index
    %47 = vector.load %arg12[%c0_31, %c64] : memref<32x128xf32, #tpu.memory_space<vmem>>, vector<32x32xf32>
    tpu.vector_store %arg12[%c0_31, %c64], %33 {strides = array<i32>} : memref<32x128xf32, #tpu.memory_space<vmem>>, vector<32x32xf32>,
    %c0_32 = arith.constant 0 : index
    %c96 = arith.constant 96 : index
    %48 = vector.load %arg12[%c0_32, %c96] : memref<32x128xf32, #tpu.memory_space<vmem>>, vector<32x32xf32>
    tpu.vector_store %arg12[%c0_32, %c96], %44 {strides = array<i32>} : memref<32x128xf32, #tpu.memory_space<vmem>>, vector<32x32xf32>,
    return
  }
  func.func @transform_0(%arg0: i32) -> (i32, i32) {
    %c0_i32 = arith.constant 0 : i32
    %c0_i32_0 = arith.constant 0 : i32
    %c0_i32_1 = arith.constant 0 : i32
    return %c0_i32, %c0_i32_0 : i32, i32
  }
  func.func @transform_1(%arg0: i32) -> (i32, i32) {
    %c0_i32 = arith.constant 0 : i32
    %c0_i32_0 = arith.constant 0 : i32
    %c0_i32_1 = arith.constant 0 : i32
    return %c0_i32, %c0_i32_0 : i32, i32
  }
  func.func @transform_2(%arg0: i32) -> (i32, i32) {
    %c0_i32 = arith.constant 0 : i32
    %c0_i32_0 = arith.constant 0 : i32
    %c0_i32_1 = arith.constant 0 : i32
    return %c0_i32, %c0_i32_0 : i32, i32
  }
  func.func @transform_3(%arg0: i32) -> (i32, i32) {
    %c0_i32 = arith.constant 0 : i32
    %c0_i32_0 = arith.constant 0 : i32
    %c0_i32_1 = arith.constant 0 : i32
    return %c0_i32, %c0_i32_0 : i32, i32
  }
  func.func @transform_4(%arg0: i32) -> (i32, i32) {
    %c0_i32 = arith.constant 0 : i32
    %c0_i32_0 = arith.constant 0 : i32
    %c0_i32_1 = arith.constant 0 : i32
    return %c0_i32, %c0_i32_0 : i32, i32
  }
  func.func @transform_5(%arg0: i32) -> (i32, i32) {
    %c0_i32 = arith.constant 0 : i32
    %c0_i32_0 = arith.constant 0 : i32
    %c0_i32_1 = arith.constant 0 : i32
    return %c0_i32, %c0_i32_0 : i32, i32
  }
  func.func @transform_6(%arg0: i32) -> (i32, i32) {
    %c0_i32 = arith.constant 0 : i32
    %c0_i32_0 = arith.constant 0 : i32
    %c0_i32_1 = arith.constant 0 : i32
    return %c0_i32, %c0_i32_0 : i32, i32
  }
  func.func @transform_7(%arg0: i32) -> (i32, i32) {
    %c0_i32 = arith.constant 0 : i32
    %c0_i32_0 = arith.constant 0 : i32
    %c0_i32_1 = arith.constant 0 : i32
    return %c0_i32, %c0_i32_0 : i32, i32
  }
  func.func @transform_8(%arg0: i32) -> (i32, i32) {
    %c0_i32 = arith.constant 0 : i32
    %c0_i32_0 = arith.constant 0 : i32
    %c0_i32_1 = arith.constant 0 : i32
    return %c0_i32, %c0_i32_0 : i32, i32
  }
  func.func @transform_9(%arg0: i32) -> (i32, i32) {
    %c0_i32 = arith.constant 0 : i32
    %c0_i32_0 = arith.constant 0 : i32
    %c0_i32_1 = arith.constant 0 : i32
    return %c0_i32, %c0_i32_0 : i32, i32
  }
  func.func @transform_10(%arg0: i32) -> (i32, i32) {
    %c0_i32 = arith.constant 0 : i32
    %c0_i32_0 = arith.constant 0 : i32
    %c0_i32_1 = arith.constant 0 : i32
    return %c0_i32, %c0_i32_0 : i32, i32
  }
  func.func @transform_11(%arg0: i32) -> (i32, i32) {
    %c0_i32 = arith.constant 0 : i32
    %c0_i32_0 = arith.constant 0 : i32
    %c0_i32_1 = arith.constant 0 : i32
    return %c0_i32, %c0_i32_0 : i32, i32
  }
}

</mosaic_0001>

<bundles_post_ra>
// kernel: tpu_custom_call.1
= control target key start
LH: loop header
LB: loop body
LE: loop exit
PB: predicated region body
PF: predicated region fallthrough
CT: control target
= control target key end

     0   :  { %16 = vsyncpa [#allocation3], 0  ;;  %s1333_s0 = inlined_call_operand.vmem [shape: bf16[32,32], index: 0, kind: input, shape index: {}]   ;;  %s1334_s1 = inlined_call_operand.vmem [shape: bf16[32,4], index: 1, kind: input, shape index: {}]   ;;  %s1335_s2 = inlined_call_operand.hbm [shape: f32[32,32], index: 2, kind: input, shape index: {}]   ;;  %s1336_s3 = inlined_call_operand.hbm [shape: bf16[4,32], index: 3, kind: input, shape index: {}]   ;;  %s1337_s4 = inlined_call_operand.vmem [shape: bf16[32,32], index: 4, kind: input, shape index: {}]   ;;  %s1338_s5 = inlined_call_operand.hbm [shape: bf16[32,32], index: 5, kind: input, shape index: {}]   ;;  %s1339_s6 = inlined_call_operand.hbm [shape: bf16[32,32], index: 6, kind: input, shape index: {}]   ;;  %s1340_s7 = inlined_call_operand.vmem [shape: f32[1,32], index: 7, kind: input, shape index: {}]   ;;  %s1341_s8 = inlined_call_operand.vmem [shape: f32[1,32], index: 8, kind: input, shape index: {}]   ;;  %s1342_s9 = inlined_call_operand.vmem [shape: f32[1,32], index: 9, kind: input, shape index: {}]   ;;  %s1343_s10 = inlined_call_operand.vmem [shape: f32[1,32], index: 10, kind: input, shape index: {}]   ;;  %s1344_s11 = inlined_call_operand.hbm [shape: f32[32,128], index: 11, kind: output, shape index: {}]  }
   0x1   :  { %17 = vsyncpa [#allocation6], 0 }
   0x2   :  { %18 = vsyncpa [#allocation9], 0 }
   0x3   :  { %19 = vsyncpa [#allocation4], 0  ;;  %s1085_s17 = smov [#allocation5]   ;;  %s1086_s19 = smov [#allocation2]  }
   0x4   :  { %s42_s18 = sshll.u32 %s1085_s17, 4  ;;  %s29_s20 = sshll.u32 %s1086_s19, 4  ;;  %s43_s18 = int_to_ptr.vmem [resolvable:$true] %s42_s18  ;;  %s1156_s20 = int_to_ptr.vmem [resolvable:$true] %s29_s20 }
   0x5   :  { %s967_s23 = scalar_lea.hbm %s1336_s3, 32 }
   0x6   :  { %p968_p0 = scmp.ne.s32.totalorder %s1336_s3, %s967_s23  ;;  %p971_p1 = scmp.lt.u32.totalorder %s967_s23, %s1336_s3 }
   0x8   :  { %p973_p2 = pnand %p971_p1, %p968_p0 }
   0xa   :  { %976 = shalt.err (!%p973_p2)
}
   0xb   :  { %s977_s28 = scalar_lea.vmem %s43_s18, 32  ;;  %p982_p4 = scmp.lt.s32.totalorder %s43_s18, %s43_s18 }
   0xc   :  { %p978_p3 = scmp.ne.s32.totalorder %s43_s18, %s977_s28  ;;  %p983_p5 = scmp.lt.s32.totalorder %s977_s28, %s977_s28 }
   0xe   :  { %p984_p6 = por %p983_p5, %p982_p4 }
  0x10   :  { %p985_p7 = pnand %p984_p6, %p978_p3 }
  0x12   :  { %988 = shalt.err (!%p985_p7)
}
  0x13   :  { %45 = dma.hbm_to_vmem [thread:$0]  %s1336_s3, 32, %s43_s18, [#allocation6]  }
  0x14   :  { %s989_s14 = scalar_lea.hbm %s1335_s2, 512 }
  0x15   :  { %p990_p8 = scmp.ne.s32.totalorder %s1335_s2, %s989_s14  ;;  %p993_p9 = scmp.lt.u32.totalorder %s989_s14, %s1335_s2 }
  0x17   :  { %p995_p10 = pnand %p993_p9, %p990_p8 }
  0x19   :  { %998 = shalt.err (!%p995_p10)
}
  0x1a   :  { %s999_s21 = scalar_lea.vmem %s1156_s20, 512  ;;  %p1004_p12 = scmp.lt.s32.totalorder %s1156_s20, %s1156_s20 }
  0x1b   :  { %p1000_p11 = scmp.ne.s32.totalorder %s1156_s20, %s999_s21  ;;  %p1005_p13 = scmp.lt.s32.totalorder %s999_s21, %s999_s21 }
  0x1d   :  { %p1006_p0 = por %p1005_p13, %p1004_p12 }
  0x1f   :  { %p1007_p1 = pnand %p1006_p0, %p1000_p11 }
  0x21   :  { %1010 = shalt.err (!%p1007_p1)
}
  0x22   :  { %s1087_s3 = smov 128   ;;  %s1088_s18 = smov 8  }
  0x23   :  { %35 = dma.hbm_to_vmem [thread:$0]  %s1335_s2, 512, %s1156_s20, [#allocation3], %s1087_s3, %s1087_s3, %s1088_s18  }
  0x24   :  { %s1089_s24 = smov [#allocation7]   ;;  %s1011_s28 = scalar_lea.hbm %s1338_s5, 256 }
  0x25   :  { %s53_s25 = sshll.u32 %s1089_s24, 4  ;;  %p1012_p2 = scmp.ne.s32.totalorder %s1338_s5, %s1011_s28  ;;  %s54_s25 = int_to_ptr.vmem [resolvable:$true] %s53_s25 }
  0x26   :  { %p1015_p3 = scmp.lt.u32.totalorder %s1011_s28, %s1338_s5 }
  0x28   :  { %p1017_p4 = pnand %p1015_p3, %p1012_p2 }
  0x2a   :  { %1020 = shalt.err (!%p1017_p4)
}
  0x2b   :  { %s1021_s14 = scalar_lea.vmem %s54_s25, 256  ;;  %p1026_p6 = scmp.lt.s32.totalorder %s54_s25, %s54_s25 }
  0x2c   :  { %p1022_p5 = scmp.ne.s32.totalorder %s54_s25, %s1021_s14  ;;  %p1027_p7 = scmp.lt.s32.totalorder %s1021_s14, %s1021_s14 }
  0x2e   :  { %p1028_p8 = por %p1027_p7, %p1026_p6 }
  0x30   :  { %p1029_p9 = pnand %p1028_p8, %p1022_p5 }
  0x32   :  { %1032 = shalt.err (!%p1029_p9)
}
  0x33   :  { %s1090_s2 = smov 64   ;;  %s1091_s20 = smov 4  }
  0x34   :  { %59 = dma.hbm_to_vmem [thread:$0]  %s1338_s5, 256, %s54_s25, [#allocation6], %s1090_s2, %s1090_s2, %s1091_s20  }
  0x35   :  { %s1092_s17 = smov [#allocation8]   ;;  %s1033_s23 = scalar_lea.hbm %s1339_s6, 256 }
  0x36   :  { %s65_s19 = sshll.u32 %s1092_s17, 4  ;;  %p1034_p10 = scmp.ne.s32.totalorder %s1339_s6, %s1033_s23  ;;  %s66_s19 = int_to_ptr.vmem [resolvable:$true] %s65_s19 }
  0x37   :  { %p1037_p11 = scmp.lt.u32.totalorder %s1033_s23, %s1339_s6 }
  0x39   :  { %p1039_p12 = pnand %p1037_p11, %p1034_p10 }
  0x3b   :  { %1042 = shalt.err (!%p1039_p12)
}
  0x3c   :  { %s1043_s29 = scalar_lea.vmem %s66_s19, 256  ;;  %p1048_p0 = scmp.lt.s32.totalorder %s66_s19, %s66_s19 }
  0x3d   :  { %p1044_p13 = scmp.ne.s32.totalorder %s66_s19, %s1043_s29  ;;  %p1049_p1 = scmp.lt.s32.totalorder %s1043_s29, %s1043_s29 }
  0x3f   :  { %p1050_p2 = por %p1049_p1, %p1048_p0 }
  0x41   :  { %p1051_p3 = pnand %p1050_p2, %p1044_p13 }
  0x43   :  { %1054 = shalt.err (!%p1051_p3)
}
  0x44   :  { %71 = dma.hbm_to_vmem [thread:$0]  %s1339_s6, 256, %s66_s19, [#allocation9], %s1090_s2, %s1090_s2, %s1091_s20  }
  0x45   :  { %1077 = dma.done.wait [#allocation3], 512  }
  0x46   :  { %1078 = vsyncadd [#allocation3], 4294966784 }
  0x47   :  { %1079 = dma.done.wait [#allocation6], 288  }
  0x48   :  { %1080 = vsyncadd [#allocation6], 4294967008 }
  0x49   :  { %1081 = dma.done.wait [#allocation9], 256  }
  0x4a   :  { %1082 = vsyncadd [#allocation9], 4294967040  ;;  %vm123_vm0 = vcmask 1041408   ;;  %vm116_vm1 = vcmask 31744   ;;  %v105_v0 = vld [vmem:[#allocation5] sm:$0x3] }
  0x4b   :  { %913 = vmatprep.subr.msk.bf16.mxu0 %vm123_vm0, %v105_v0  ;;  %v125_v1 = vsel %vm123_vm0, %v105_v0, 0  ;;  %v925_v2 = vld [vmem:[%s1334_s1] sm:$0xff]   ;;  %v926_v3 = vld [vmem:[%s1334_s1 + $0x8] sm:$0xff]   ;;  %vm188_vm2 = vcmask 261120   ;;  %v1246_v14 = vld [vmem:[#allocation2 + $0x10] sm:$0xff]  ;;  %vm724_vm3 = vcmask 523520  }
  0x4c   :  { %852 = vmatpush3.bf16.msra.mxu0 %v125_v1  ;;  %853 = vmatprep.mubr.msk.bf16.mxu0 %vm116_vm1, %v925_v2  ;;  %v1227_v4 = vld [vmem:[%s1333_s0] sm:$0xff]   ;;  %v1234_v11 = vld [vmem:[%s1333_s0 + $0x8] sm:$0xff]   ;;  %v1253_v18 = vld [vmem:[#allocation2 + $0x18] sm:$0xff]  ;;  %vm745_vm4 = vcmask 785920   ;;  %vm766_vm5 = vcmask 1048320   ;;  %s1095_s26 = smov [#allocation10]  }
  0x4d   :  { %861 = vmatprep.mubr.msk.bf16.mxu1 %vm188_vm2, %v1227_v4  ;;  %v929_v12 = vld [vmem:[%s1337_s4] sm:$0xff]   ;;  %v930_v13 = vld [vmem:[%s1337_s4 + $0x8] sm:$0xff]   ;;  %s776_s27 = sshll.u32 %s1095_s26, 4  ;;  %s777_s27 = int_to_ptr.vmem [resolvable:$true] %s776_s27 }
  0x4e   :  { %865 = vmatprep.subr.bf16.mxu0 %v929_v12  ;;  %v1248_v15 = vld [vmem:[#allocation2] sm:$0xff]  ;;  %v1256_v21 = vld [vmem:[#allocation2 + $0x8] sm:$0xff]  ;;  %s1055_s28 = scalar_lea.vmem %s777_s27, 512  ;;  %p1060_p5 = scmp.lt.s32.totalorder %s777_s27, %s777_s27 }
  0x4f   :  { %854 = vmatmul.mubr.msk.bf16.vlgmr.msra.gmra.mrb[0].mxu0 %vm116_vm1, %v926_v3  ;;  %v798_v17 = vld [vmem:[%s1340_s7] ss:$0 sm:$0xff]  ;;  %v931_v47 = vld [vmem:[#allocation7] sm:$0xff]   ;;  %v932_v48 = vld [vmem:[#allocation7 + $0x8] sm:$0xff]   ;;  %p1056_p4 = scmp.ne.s32.totalorder %s777_s27, %s1055_s28  ;;  %p1061_p6 = scmp.lt.s32.totalorder %s1055_s28, %s1055_s28 }
  0x50   :  { %866 = vmatpush3.bf16.msra.mxu0 %v929_v12  ;;  %v805_v50 = vld [vmem:[%s1341_s8] ss:$0 sm:$0xff]  ;;  %s1093_s8 = smov 32  }
  0x51   :  { %867 = vmatprep.subr.bf16.mxu0 %v930_v13  ;;  %p1062_p7 = por %p1061_p6, %p1060_p5 }
  0x53   :  { %p1063_p8 = pnand %p1062_p7, %p1056_p4 }
  0x54   :  { %868 = vmatpush3.bf16.msra.mxu0 %v930_v13 }
  0x55   :  { %881 = vmatprep.subr.bf16.mxu0 %v931_v47 }
 0x122   :  { %v855_v5 = vpop.f32.mrb[0].mxu0 }
 0x123   :  { %v161_v6 = vpop.f32.mrb[1].mxu0 }
 0x124   :  { %v856_v7 = vpop.f32.mrb[2].mxu0 }
 0x125   :  { %v177_v8 = vpack.c.bf16 %v856_v7, %v855_v5  ;;  %v164_v9 = vpop.f32.mrb[3].mxu0 }
 0x126   :  { %v176_v10 = vpack.c.bf16 %v164_v9, %v161_v6 }
 0x128   :  { %857 = vmatprep.subr.bf16.mxu1 %v176_v10 }
 0x129   :  { %858 = vmatpush3.bf16.msra.mxu1 %v176_v10 }
 0x12a   :  { %859 = vmatprep.subr.bf16.mxu1 %v177_v8 }
 0x12d   :  { %860 = vmatpush3.bf16.msra.mxu1 %v177_v8 }
 0x130   :  { %862 = vmatmul.mubr.msk.bf16.vlgmr.msra.gmra.mrb[0].mxu1 %vm188_vm2, %v1234_v11 }
 0x131   :  { %877 = vmatprep.mubr.msk.bf16.mxu1 %vm188_vm2, %v1227_v4 }
 0x203   :  { %v863_v16 = vpop.f32.mrb[0].mxu1 }
 0x204   :  { %v246_v19 = vmul.f32 %v863_v16, %v1246_v14  ;;  %v229_v20 = vpop.f32.mrb[1].mxu1 }
 0x205   :  { %v244_v22 = vmul.f32 %v229_v20, %v1248_v15  ;;  %v864_v23 = vpop.f32.mrb[2].mxu1 }
 0x206   :  { %v257_v24 = vadd.f32 %v798_v17, %v246_v19  ;;  %v247_v25 = vmul.f32 %v864_v23, %v1253_v18  ;;  %v232_v26 = vpop.f32.mrb[3].mxu1 }
 0x207   :  { %v255_v27 = vadd.f32 %v798_v17, %v244_v22  ;;  %v245_v28 = vmul.f32 %v232_v26, %v1256_v21 }
 0x208   :  { %935 = vtanh.f32 %v257_v24  ;;  %v258_v29 = vadd.f32 %v798_v17, %v247_v25  ;;  %v933_v24 = vld [vmem:[#allocation8] sm:$0xff]   ;;  %v934_v25 = vld [vmem:[#allocation8 + $0x8] sm:$0xff]  }
 0x209   :  { %937 = vtanh.f32 %v255_v27  ;;  %v256_v30 = vadd.f32 %v798_v17, %v245_v28  ;;  %v812_v27 = vld [vmem:[%s1342_s9] ss:$0 sm:$0xff] }
 0x20a   :  { %939 = vtanh.f32 %v258_v29 }
 0x20b   :  { %941 = vtanh.f32 %v256_v30 }
 0x212   :  { %v936_v31 = vpop.eup %935 }
 0x213   :  { %v938_v32 = vpop.eup %937  ;;  %706 = vst.msk [vmem:[#allocation10 + $0x10] sm:$0xff] %vm188_vm2, %v936_v31  ;;  %v265_v35 = vmul.f32 %v936_v31, %v1246_v14 }
 0x214   :  { %v940_v33 = vpop.eup %939  ;;  %704 = vst.msk [vmem:[#allocation10] sm:$0xff] %vm188_vm2, %v938_v32  ;;  %v263_v37 = vmul.f32 %v938_v32, %v1248_v15 }
 0x215   :  { %v942_v34 = vpop.eup %941  ;;  %707 = vst.msk [vmem:[#allocation10 + $0x18] sm:$0xff] %vm188_vm2, %v940_v33  ;;  %v266_v36 = vmul.f32 %v940_v33, %v1253_v18 }
 0x216   :  { %705 = vst.msk [vmem:[#allocation10 + $0x8] sm:$0xff] %vm188_vm2, %v942_v34  ;;  %v264_v38 = vmul.f32 %v942_v34, %v1256_v21 }
 0x217   :  { %v268_v39 = vpack.c.bf16 %v266_v36, %v265_v35 }
 0x218   :  { %v267_v40 = vpack.c.bf16 %v264_v38, %v263_v37 }
 0x21a   :  { %869 = vmatprep.mubr.msk.bf16.mxu0 %vm188_vm2, %v267_v40 }
 0x21b   :  { %870 = vmatmul.mubr.msk.bf16.vlgmr.msra.gmra.mrb[4].mxu0 %vm188_vm2, %v268_v39 }
 0x21c   :  { %882 = vmatpush3.bf16.msra.mxu0 %v931_v47 }
 0x21d   :  { %883 = vmatprep.subr.bf16.mxu0 %v932_v48 }
 0x220   :  { %884 = vmatpush3.bf16.msra.mxu0 %v932_v48 }
 0x221   :  { %897 = vmatprep.subr.bf16.mxu0 %v933_v24 }
 0x2ee   :  { %v871_v41 = vpop.f32.mrb[4].mxu0 }
 0x2ef   :  { %v325_v42 = vpop.f32.mrb[5].mxu0 }
 0x2f0   :  { %v872_v43 = vpop.f32.mrb[6].mxu0 }
 0x2f1   :  { %v341_v44 = vpack.c.bf16 %v872_v43, %v871_v41  ;;  %v328_v45 = vpop.f32.mrb[7].mxu0 }
 0x2f2   :  { %v340_v46 = vpack.c.bf16 %v328_v45, %v325_v42 }
 0x2f4   :  { %873 = vmatprep.subr.bf16.mxu1 %v340_v46 }
 0x2f5   :  { %874 = vmatpush3.bf16.msra.mxu1 %v340_v46 }
 0x2f6   :  { %875 = vmatprep.subr.bf16.mxu1 %v341_v44 }
 0x2f9   :  { %876 = vmatpush3.bf16.msra.mxu1 %v341_v44 }
 0x2fc   :  { %878 = vmatmul.mubr.msk.bf16.vlgmr.msra.gmra.mrb[4].mxu1 %vm188_vm2, %v1234_v11 }
 0x2fd   :  { %893 = vmatprep.mubr.msk.bf16.mxu1 %vm188_vm2, %v1227_v4 }
 0x3cf   :  { %v879_v49 = vpop.f32.mrb[4].mxu1 }
 0x3d0   :  { %v393_v51 = vmul.f32 %v879_v49, %v1246_v14  ;;  %v376_v52 = vpop.f32.mrb[5].mxu1 }
 0x3d1   :  { %v391_v53 = vmul.f32 %v376_v52, %v1248_v15  ;;  %v880_v54 = vpop.f32.mrb[6].mxu1 }
 0x3d2   :  { %v404_v55 = vadd.f32 %v805_v50, %v393_v51  ;;  %v394_v56 = vmul.f32 %v880_v54, %v1253_v18  ;;  %v379_v57 = vpop.f32.mrb[7].mxu1 }
 0x3d3   :  { %v402_v58 = vadd.f32 %v805_v50, %v391_v53  ;;  %v392_v59 = vmul.f32 %v379_v57, %v1256_v21 }
 0x3d4   :  { %943 = vtanh.f32 %v404_v55  ;;  %v405_v60 = vadd.f32 %v805_v50, %v394_v56 }
 0x3d5   :  { %945 = vtanh.f32 %v402_v58  ;;  %v403_v61 = vadd.f32 %v805_v50, %v392_v59  ;;  %v819_v59 = vld [vmem:[%s1343_s10] ss:$0 sm:$0xff]  ;;  %s1094_s10 = smov 96  }
 0x3d6   :  { %947 = vtanh.f32 %v405_v60 }
 0x3d7   :  { %949 = vtanh.f32 %v403_v61 }
 0x3de   :  { %v944_v62 = vpop.eup %943 }
 0x3df   :  { %v946_v63 = vpop.eup %945  ;;  %716 = vrot.lane.b32.xlu1 %v944_v62, %s1093_s8  ;;  %v412_v2 = vmul.f32 %v944_v62, %v1246_v14 }
 0x3e0   :  { %v948_v0 = vpop.eup %947  ;;  %712 = vrot.lane.b32.xlu0 %v946_v63, %s1093_s8  ;;  %v410_v5 = vmul.f32 %v946_v63, %v1248_v15 }
 0x3e1   :  { %v950_v1 = vpop.eup %949  ;;  %v413_v3 = vmul.f32 %v948_v0, %v1253_v18 }
 0x3e2   :  { %v411_v6 = vmul.f32 %v950_v1, %v1256_v21 }
 0x3e3   :  { %718 = vrot.lane.b32.xlu1 %v948_v0, %s1093_s8  ;;  %v415_v7 = vpack.c.bf16 %v413_v3, %v412_v2 }
 0x3e4   :  { %714 = vrot.lane.b32.xlu0 %v950_v1, %s1093_s8  ;;  %v414_v8 = vpack.c.bf16 %v411_v6, %v410_v5 }
 0x3e6   :  { %885 = vmatprep.mubr.msk.bf16.mxu0 %vm188_vm2, %v414_v8 }
 0x3e7   :  { %886 = vmatmul.mubr.msk.bf16.vlgmr.msra.gmra.mrb[8].mxu0 %vm188_vm2, %v415_v7 }
 0x3e8   :  { %898 = vmatpush3.bf16.msra.mxu0 %v933_v24 }
 0x3e9   :  { %899 = vmatprep.subr.bf16.mxu0 %v934_v25 }
 0x3ec   :  { %900 = vmatpush3.bf16.msra.mxu0 %v934_v25 }
 0x451   :  { %v717_v9 = vpop.permute.xlu1 %716 }
 0x452   :  { %727 = vst.msk [vmem:[#allocation10 + $0x10] sm:$0xff] %vm724_vm3, %v717_v9  ;;  %v713_v10 = vpop.permute.xlu0 %712 }
 0x453   :  { %725 = vst.msk [vmem:[#allocation10] sm:$0xff] %vm724_vm3, %v713_v10 }
 0x455   :  { %v719_v12 = vpop.permute.xlu1 %718 }
 0x456   :  { %728 = vst.msk [vmem:[#allocation10 + $0x18] sm:$0xff] %vm724_vm3, %v719_v12  ;;  %v715_v13 = vpop.permute.xlu0 %714 }
 0x457   :  { %726 = vst.msk [vmem:[#allocation10 + $0x8] sm:$0xff] %vm724_vm3, %v715_v13 }
 0x4ba   :  { %v887_v16 = vpop.f32.mrb[8].mxu0 }
 0x4bb   :  { %v472_v17 = vpop.f32.mrb[9].mxu0 }
 0x4bc   :  { %v888_v19 = vpop.f32.mrb[10].mxu0 }
 0x4bd   :  { %v488_v20 = vpack.c.bf16 %v888_v19, %v887_v16  ;;  %v475_v22 = vpop.f32.mrb[11].mxu0 }
 0x4be   :  { %v487_v23 = vpack.c.bf16 %v475_v22, %v472_v17 }
 0x4c0   :  { %889 = vmatprep.subr.bf16.mxu1 %v487_v23 }
 0x4c1   :  { %890 = vmatpush3.bf16.msra.mxu1 %v487_v23 }
 0x4c2   :  { %891 = vmatprep.subr.bf16.mxu1 %v488_v20 }
 0x4c5   :  { %892 = vmatpush3.bf16.msra.mxu1 %v488_v20 }
 0x4c8   :  { %894 = vmatmul.mubr.msk.bf16.vlgmr.msra.gmra.mrb[8].mxu1 %vm188_vm2, %v1234_v11 }
 0x4c9   :  { %909 = vmatprep.mubr.msk.bf16.mxu1 %vm188_vm2, %v1227_v4 }
 0x59b   :  { %v895_v26 = vpop.f32.mrb[8].mxu1 }
 0x59c   :  { %v540_v28 = vmul.f32 %v895_v26, %v1246_v14  ;;  %v523_v29 = vpop.f32.mrb[9].mxu1 }
 0x59d   :  { %v538_v30 = vmul.f32 %v523_v29, %v1248_v15  ;;  %v896_v31 = vpop.f32.mrb[10].mxu1 }
 0x59e   :  { %v551_v32 = vadd.f32 %v812_v27, %v540_v28  ;;  %v541_v4 = vmul.f32 %v896_v31, %v1253_v18  ;;  %v526_v33 = vpop.f32.mrb[11].mxu1 }
 0x59f   :  { %v549_v34 = vadd.f32 %v812_v27, %v538_v30  ;;  %v539_v35 = vmul.f32 %v526_v33, %v1256_v21 }
 0x5a0   :  { %951 = vtanh.f32 %v551_v32  ;;  %v552_v36 = vadd.f32 %v812_v27, %v541_v4 }
 0x5a1   :  { %953 = vtanh.f32 %v549_v34  ;;  %v550_v37 = vadd.f32 %v812_v27, %v539_v35 }
 0x5a2   :  { %955 = vtanh.f32 %v552_v36 }
 0x5a3   :  { %957 = vtanh.f32 %v550_v37 }
 0x5aa   :  { %v952_v38 = vpop.eup %951 }
 0x5ab   :  { %v954_v39 = vpop.eup %953  ;;  %737 = vrot.lane.b32.xlu0 %v952_v38, %s1090_s2  ;;  %v559_v42 = vmul.f32 %v952_v38, %v1246_v14 }
 0x5ac   :  { %v956_v40 = vpop.eup %955  ;;  %v557_v44 = vmul.f32 %v954_v39, %v1248_v15 }
 0x5ad   :  { %v958_v41 = vpop.eup %957  ;;  %739 = vrot.lane.b32.xlu1 %v956_v40, %s1090_s2  ;;  %v560_v43 = vmul.f32 %v956_v40, %v1253_v18 }
 0x5ae   :  { %v558_v45 = vmul.f32 %v958_v41, %v1256_v21 }
 0x5af   :  { %733 = vrot.lane.b32.xlu0 %v954_v39, %s1090_s2  ;;  %v562_v46 = vpack.c.bf16 %v560_v43, %v559_v42 }
 0x5b0   :  { %v561_v47 = vpack.c.bf16 %v558_v45, %v557_v44 }
 0x5b1   :  { %735 = vrot.lane.b32.xlu1 %v958_v41, %s1090_s2 }
 0x5b2   :  { %901 = vmatprep.mubr.msk.bf16.mxu0 %vm188_vm2, %v561_v47 }
 0x5b3   :  { %902 = vmatmul.mubr.msk.bf16.vlgmr.msra.gmra.mrb[12].mxu0 %vm188_vm2, %v562_v46 }
 0x61d   :  { %v738_v48 = vpop.permute.xlu0 %737 }
 0x61e   :  { %748 = vst.msk [vmem:[#allocation10 + $0x10] sm:$0xff] %vm745_vm4, %v738_v48 }
 0x61f   :  { %v740_v49 = vpop.permute.xlu1 %739 }
 0x620   :  { %749 = vst.msk [vmem:[#allocation10 + $0x18] sm:$0xff] %vm745_vm4, %v740_v49 }
 0x621   :  { %v734_v50 = vpop.permute.xlu0 %733 }
 0x622   :  { %746 = vst.msk [vmem:[#allocation10] sm:$0xff] %vm745_vm4, %v734_v50 }
 0x623   :  { %v736_v51 = vpop.permute.xlu1 %735 }
 0x624   :  { %747 = vst.msk [vmem:[#allocation10 + $0x8] sm:$0xff] %vm745_vm4, %v736_v51 }
 0x686   :  { %v903_v52 = vpop.f32.mrb[12].mxu0 }
 0x687   :  { %v619_v53 = vpop.f32.mrb[13].mxu0 }
 0x688   :  { %v904_v54 = vpop.f32.mrb[14].mxu0 }
 0x689   :  { %v635_v55 = vpack.c.bf16 %v904_v54, %v903_v52  ;;  %v622_v56 = vpop.f32.mrb[15].mxu0 }
 0x68a   :  { %v634_v57 = vpack.c.bf16 %v622_v56, %v619_v53 }
 0x68c   :  { %905 = vmatprep.subr.bf16.mxu1 %v634_v57 }
 0x68d   :  { %906 = vmatpush3.bf16.msra.mxu1 %v634_v57 }
 0x68e   :  { %907 = vmatprep.subr.bf16.mxu1 %v635_v55 }
 0x691   :  { %908 = vmatpush3.bf16.msra.mxu1 %v635_v55 }
 0x694   :  { %910 = vmatmul.mubr.msk.bf16.vlgmr.msra.gmra.mrb[12].mxu1 %vm188_vm2, %v1234_v11 }
 0x767   :  { %v911_v58 = vpop.f32.mrb[12].mxu1 }
 0x768   :  { %v670_v60 = vpop.f32.mrb[13].mxu1  ;;  %v687_v61 = vmul.f32 %v911_v58, %v1246_v14 }
 0x769   :  { %v685_v62 = vmul.f32 %v670_v60, %v1248_v15  ;;  %v912_v63 = vpop.f32.mrb[14].mxu1 }
 0x76a   :  { %v673_v0 = vpop.f32.mrb[15].mxu1  ;;  %v688_v2 = vmul.f32 %v912_v63, %v1253_v18  ;;  %v698_v5 = vadd.f32 %v819_v59, %v687_v61 }
 0x76b   :  { %v696_v1 = vadd.f32 %v819_v59, %v685_v62  ;;  %v686_v3 = vmul.f32 %v673_v0, %v1256_v21 }
 0x76c   :  { %v699_v6 = vadd.f32 %v819_v59, %v688_v2 }
 0x76d   :  { %959 = vtanh.f32 %v696_v1  ;;  %v697_v11 = vadd.f32 %v819_v59, %v686_v3 }
 0x76f   :  { %961 = vtanh.f32 %v697_v11 }
 0x770   :  { %963 = vtanh.f32 %v698_v5 }
 0x771   :  { %965 = vtanh.f32 %v699_v6 }
 0x777   :  { %v960_v7 = vpop.eup %959 }
 0x778   :  { %754 = vrot.lane.b32.xlu0 %v960_v7, %s1094_s10 }
 0x779   :  { %v962_v14 = vpop.eup %961 }
 0x77a   :  { %756 = vrot.lane.b32.xlu1 %v962_v14, %s1094_s10  ;;  %v964_v15 = vpop.eup %963 }
 0x77b   :  { %v966_v8 = vpop.eup %965 }
 0x77c   :  { %758 = vrot.lane.b32.xlu0 %v964_v15, %s1094_s10 }
 0x77e   :  { %760 = vrot.lane.b32.xlu1 %v966_v8, %s1094_s10 }
 0x7ea   :  { %v755_v18 = vpop.permute.xlu0 %754 }
 0x7eb   :  { %767 = vst.msk [vmem:[#allocation10] sm:$0xff] %vm766_vm5, %v755_v18 }
 0x7ec   :  { %v757_v21 = vpop.permute.xlu1 %756 }
 0x7ed   :  { %768 = vst.msk [vmem:[#allocation10 + $0x8] sm:$0xff] %vm766_vm5, %v757_v21 }
 0x7ee   :  { %v759_v9 = vpop.permute.xlu0 %758 }
 0x7ef   :  { %769 = vst.msk [vmem:[#allocation10 + $0x10] sm:$0xff] %vm766_vm5, %v759_v9 }
 0x7f0   :  { %v761_v10 = vpop.permute.xlu1 %760 }
 0x7f1   :  { %770 = vst.msk [vmem:[#allocation10 + $0x18] sm:$0xff] %vm766_vm5, %v761_v10 }
 0x7f2   :  { %1066 = shalt.err (!%p1063_p8)
}
 0x7f3   :  { %s1067_s25 = scalar_lea.hbm %s1344_s11, 512 }
 0x7f4   :  { %p1068_p9 = scmp.ne.s32.totalorder %s1344_s11, %s1067_s25  ;;  %p1071_p10 = scmp.lt.u32.totalorder %s1067_s25, %s1344_s11 }
 0x7f6   :  { %p1073_p11 = pnand %p1071_p10, %p1068_p9 }
 0x7f8   :  { %1076 = shalt.err (!%p1073_p11)
}
 0x7f9   :  { %782 = dma.vmem_to_hbm [thread:$0]  %s777_s27, 512, %s1344_s11, [#allocation4], %s1087_s3, %s1087_s3, %s1088_s18  }
 0x7fa   :  { %1083 = dma.done.wait [#allocation4], 512  }
 0x7fb   :  { %1084 = vsyncadd [#allocation4], 4294966784 }
 0x7fc   :  { %786 = vsyncpa [#allocation3], 1 }
 0x7fd   :  { %787 = vsyncpa [#allocation6], 1 }
 0x7fe   :  { %788 = vsyncpa [#allocation9], 1 }
 0x7ff   :  { %789 = vsyncpa [#allocation4], 1 }

</bundles_post_ra>
